<compile_context>
chip_gen: v7x
topology: tpu7x:2x2x1
jax: 0.10.0
libtpu: 0.0.40
codegen_flags: <defaults>
</compile_context>

<pallas_src>
import functools

import jax
import jax.numpy as jnp
from jax.experimental import pallas as pl
from jax.experimental.pallas import tpu as pltpu


# ---------------------------------------------------------------------------
# helpers
# ---------------------------------------------------------------------------
def _round_up(x, m):
    return ((x + m - 1) // m) * m


def _pad2d(x, rows, cols):
    r, c = x.shape
    if r == rows and c == cols:
        return x
    return jnp.pad(x, ((0, rows - r), (0, cols - c)))


def _choose_tiles(n, *, tile_m_target=512, tile_k_target=2048):
    """Pick (n_padded, tile_m, tile_k) with (8/16,128)-aligned, divisible tiles."""
    n_p = _round_up(n, 128)
    if n_p <= tile_m_target:
        tile_m = n_p
    else:
        tile_m = tile_m_target
        n_p = _round_up(n_p, tile_m)
    if n_p <= tile_k_target:
        tile_k = n_p
    else:
        tile_k = tile_k_target          # 2048; multiple of tile_m (512)
        n_p = _round_up(n_p, tile_k)
    # v7x megacore: keep >= 2 row tiles so the "parallel" axis feeds both TCs.
    while n_p // tile_m < 2 and tile_m >= 32 and tile_m % 16 == 0:
        tile_m //= 2
    return n_p, tile_m, tile_k


# ---------------------------------------------------------------------------
# adjacency preparation (hoisted out of the per-forward path)
# ---------------------------------------------------------------------------
def prepare_adjacency(A, *, tile_m_target=512, tile_k_target=2048):
    """Pad + bf16-cast A once and build the block-sparse K-tile table."""
    n = A.shape[0]
    n_p, tile_m, tile_k = _choose_tiles(
        n, tile_m_target=tile_m_target, tile_k_target=tile_k_target)

    a_pad = _pad2d(A.astype(jnp.float32), n_p, n_p)
    a_bf16 = a_pad.astype(jnp.bfloat16)

    n_rt = n_p // tile_m
    n_kt = n_p // tile_k
    # nonzero mask per (row-tile, k-tile) block of A
    nz = jnp.abs(a_pad).reshape(n_rt, tile_m, n_kt, tile_k).max(axis=(1, 3)) > 0.0
    kcnt = nz.sum(axis=1).astype(jnp.int32)                       # [n_rt]
    pos = jnp.arange(n_kt, dtype=jnp.int32)[None, :]
    # nonzero k indices first (ascending), zero tiles pushed to the back
    order = jnp.argsort(jnp.where(nz, pos, pos + n_kt), axis=1).astype(jnp.int32)
    # pad by repeating the last valid index -> constant block index => DMA skipped
    last = jnp.take_along_axis(order, jnp.maximum(kcnt - 1, 0)[:, None], axis=1)
    ktab = jnp.where(pos < kcnt[:, None], order, last).astype(jnp.int32)

    max_k = max(int(jnp.max(kcnt)), 1)                            # static grid extent
    ktab = ktab[:, :max_k]
    nnz_tiles = int(jnp.sum(kcnt))

    return dict(a=a_bf16, ktab=ktab, kcnt=kcnt, n=n, n_p=n_p,
                tile_m=tile_m, tile_k=tile_k, max_k=max_k, nnz_tiles=nnz_tiles)


# ---------------------------------------------------------------------------
# kernel 1:  support = X @ W   (bf16 in / bf16 out, row-tiled, lane-dense)
# ---------------------------------------------------------------------------
def _xw_kernel(x_ref, w_ref, o_ref):
    o_ref[...] = jnp.dot(
        x_ref[...], w_ref[...], preferred_element_type=jnp.float32
    ).astype(o_ref.dtype)


def xw_matmul(x_bf16, w_bf16, *, tile_m):
    n_p, f_in = x_bf16.shape
    _, f_out = w_bf16.shape
    return pl.pallas_call(
        _xw_kernel,
        out_shape=jax.ShapeDtypeStruct((n_p, f_out), jnp.bfloat16),
        grid=(n_p // tile_m,),
        in_specs=[
            pl.BlockSpec((tile_m, f_in), lambda i: (i, 0)),
            pl.BlockSpec((f_in, f_out), lambda i: (0, 0)),
        ],
        out_specs=pl.BlockSpec((tile_m, f_out), lambda i: (i, 0)),
        compiler_params=pltpu.CompilerParams(dimension_semantics=("parallel",)),
    )(x_bf16, w_bf16)


# ---------------------------------------------------------------------------
# kernel 2:  out = A @ support + b  (+ optional ReLU)
#   - resident support (fetched once), block-sparse K-tile skipping,
#   - bias folded into init, direct accumulation into f32 outputs.
# ---------------------------------------------------------------------------
def _adj_matmul_kernel(ktab_ref, kcnt_ref, a_ref, s_ref, b_ref, o_ref, *scratch,
                       apply_relu, tile_k, support_resident):
    acc_ref = scratch[0] if scratch else o_ref
    i = pl.program_id(0)
    k = pl.program_id(1)

    @pl.when(k == 0)
    def _():
        # fold bias into the accumulator init (no zero-fill + no epilogue add)
        acc_ref[...] = jnp.broadcast_to(b_ref[...], acc_ref.shape).astype(acc_ref.dtype)

    @pl.when(k < kcnt_ref[i])   # ragged reduction: skip all-zero A tiles
    def _():
        if support_resident:
            kk = ktab_ref[i, k]
            off = pl.multiple_of(kk * tile_k, tile_k)
            s_blk = s_ref[pl.ds(off, tile_k), :]
        else:
            s_blk = s_ref[...]
        acc_ref[...] += jnp.dot(
            a_ref[...], s_blk, preferred_element_type=jnp.float32
        ).astype(acc_ref.dtype)

    if scratch or apply_relu:
        @pl.when(k == pl.num_programs(1) - 1)
        def _():
            out = acc_ref[...]
            if apply_relu:
                out = jnp.maximum(out, 0.0)
            o_ref[...] = out.astype(o_ref.dtype)


def adj_matmul(a_bf16, support_bf16, bias_2d, ktab, kcnt, *,
               apply_relu, out_dtype, tile_m, tile_k, max_k, nnz_tiles):
    n_p = a_bf16.shape[0]
    f_out = support_bf16.shape[1]
    n_rt = n_p // tile_m

    support_bytes = int(support_bf16.size) * 2
    # keep the resident buffer small enough for v7x (64 MiB phys / 32 MiB default)
    support_resident = support_bytes <= (12 << 20)

    # f32 final layer: accumulate straight into o_ref (no scratch, no copy).
    use_scratch = (jnp.dtype(out_dtype) != jnp.dtype(jnp.float32))

    kernel = functools.partial(
        _adj_matmul_kernel, apply_relu=apply_relu, tile_k=tile_k,
        support_resident=support_resident)

    a_spec = pl.BlockSpec((tile_m, tile_k), lambda i, k, kt, kc: (i, kt[i, k]))
    if support_resident:
        s_spec = pl.BlockSpec((n_p, f_out), lambda i, k, kt, kc: (0, 0))
    else:
        s_spec = pl.BlockSpec((tile_k, f_out), lambda i, k, kt, kc: (kt[i, k], 0))
    b_spec = pl.BlockSpec((1, f_out), lambda i, k, kt, kc: (0, 0))
    o_spec = pl.BlockSpec((tile_m, f_out), lambda i, k, kt, kc: (i, 0))

    scratch_shapes = [pltpu.VMEM((tile_m, f_out), jnp.float32)] if use_scratch else []

    out_isz = jnp.dtype(out_dtype).itemsize
    # VMEM sizing (double-buffered inputs) -> raise the scoped limit, capped for v7x
    a_buf = tile_m * tile_k * 2
    s_buf = support_bytes if support_resident else tile_k * f_out * 2
    o_buf = tile_m * f_out * out_isz
    est = 2 * a_buf + 2 * s_buf + 2 * o_buf + (tile_m * f_out * 4 if use_scratch else 0)
    vmem_limit = int(min(48 << 20, max(32 << 20, int(est * 1.5))))

    a_traffic = nnz_tiles * tile_m * tile_k * 2
    s_traffic = support_bytes if support_resident else nnz_tiles * tile_k * f_out * 2
    cost = pl.CostEstimate(
        flops=2 * nnz_tiles * tile_m * tile_k * f_out,
        transcendentals=0,
        bytes_accessed=a_traffic + s_traffic + bias_2d.size * 4 + n_p * f_out * out_isz,
    )

    return pl.pallas_call(
        kernel,
        out_shape=jax.ShapeDtypeStruct((n_p, f_out), out_dtype),
        grid_spec=pltpu.PrefetchScalarGridSpec(
            num_scalar_prefetch=2,
            grid=(n_rt, max_k),
            in_specs=[a_spec, s_spec, b_spec],
            out_specs=o_spec,
            scratch_shapes=scratch_shapes,
        ),
        compiler_params=pltpu.CompilerParams(
            dimension_semantics=("parallel", "arbitrary"),
            vmem_limit_bytes=vmem_limit,
        ),
        cost_estimate=cost,
    )(ktab, kcnt, a_bf16, support_bf16, bias_2d)


# ---------------------------------------------------------------------------
# GCNSparse forward
# ---------------------------------------------------------------------------
def init_gcn_params(key, in_size, out_size, hid_size=256, nlayers=2):
    """Deterministic xavier_uniform weights, zero biases (mirrors reset_parameters)."""
    sizes = []
    if nlayers == 1:
        sizes.append((in_size, out_size))
    else:
        sizes.append((in_size, hid_size))
        for _ in range(nlayers - 2):
            sizes.append((hid_size, hid_size))
        sizes.append((hid_size, out_size))
    params = []
    for (fi, fo) in sizes:
        key, wkey = jax.random.split(key)
        bound = (6.0 / (fi + fo)) ** 0.5
        W = jax.random.uniform(wkey, (fi, fo), jnp.float32, -bound, bound)
        b = jnp.zeros((fo,), jnp.float32)
        params.append((W, b))
    return params


def gcn_sparse_forward(adj_prep, X, params):
    """out = layer_L(...relu(layer_1(A, X))...)   (eval mode: dropout = identity)."""
    n = adj_prep["n"]
    n_p = adj_prep["n_p"]
    tile_m = adj_prep["tile_m"]
    tile_k = adj_prep["tile_k"]
    max_k = adj_prep["max_k"]
    nnz_tiles = adj_prep["nnz_tiles"]
    a_bf16 = adj_prep["a"]
    ktab = adj_prep["ktab"]
    kcnt = adj_prep["kcnt"]

    f_in = X.shape[1]
    # hidden activations kept bf16 (MXU-native, half the HBM traffic); final f32
    h = _pad2d(X.astype(jnp.float32), n_p, _round_up(f_in, 128)).astype(jnp.bfloat16)

    nlayers = len(params)
    for li, (W, b) in enumerate(params):
        fi, fo = W.shape
        fi_p = _round_up(fi, 128)
        fo_p = _round_up(fo, 128)
        assert h.shape == (n_p, fi_p)
        w_p = _pad2d(W, fi_p, fo_p).astype(jnp.bfloat16)
        b_p = jnp.pad(b, (0, fo_p - fo)).astype(jnp.float32).reshape(1, fo_p)

        last = (li == nlayers - 1)
        # 1) support = h @ W   (computed exactly once per layer, bf16)
        support = xw_matmul(h, w_p, tile_m=tile_m)
        # 2) h = A @ support + b  (+ ReLU for non-final layers)
        h = adj_matmul(
            a_bf16, support, b_p, ktab, kcnt,
            apply_relu=not last,
            out_dtype=jnp.float32 if last else jnp.bfloat16,
            tile_m=tile_m, tile_k=tile_k, max_k=max_k, nnz_tiles=nnz_tiles,
        )
        # dropout: eval-mode identity

    out_size = params[-1][0].shape[1]
    return h[:n, :out_size]


# ---------------------------------------------------------------------------
# demo / correctness check
# ---------------------------------------------------------------------------
if __name__ == "__main__":
    key = jax.random.PRNGKey(0)
    N, in_size, hid_size, out_size = 64, 48, 64, 16

    k_adj, k_feat, k_param = jax.random.split(key, 3)

    # Small symmetric normalized adjacency (dense stand-in for SparseMatrix).
    raw = jax.random.uniform(k_adj, (N, N), jnp.float32)
    adj = (raw + raw.T) > 1.4
    adj = jnp.asarray(adj, jnp.float32) + jnp.eye(N, dtype=jnp.float32)   # self loops
    deg = jnp.sum(adj, axis=1)
    d_inv_sqrt = 1.0 / jnp.sqrt(deg)
    A = adj * d_inv_sqrt[:, None] * d_inv_sqrt[None, :]                   # D^-1/2 A D^-1/2

    X = jax.random.normal(k_feat, (N, in_size), jnp.float32)

    params = init_gcn_params(k_param, in_size, out_size,
                             hid_size=hid_size, nlayers=2)

    adj_prep = prepare_adjacency(A)          # pad + bf16 cast + tile tables, once
    out = gcn_sparse_forward(adj_prep, X, params)
    out = jax.block_until_ready(out)

    # Pure-JAX reference mirroring the kernel's bf16 roundings.
    A_bf = A.astype(jnp.bfloat16).astype(jnp.float32)
    h_ref = X.astype(jnp.bfloat16).astype(jnp.float32)
    for i, (W, b) in enumerate(params):
        W_bf = W.astype(jnp.bfloat16).astype(jnp.float32)
        support_ref = jnp.dot(h_ref, W_bf, preferred_element_type=jnp.float32)
        support_ref = support_ref.astype(jnp.bfloat16).astype(jnp.float32)
        h_ref = jnp.dot(A_bf, support_ref, preferred_element_type=jnp.float32) + b
        if i != len(params) - 1:
            h_ref = jnp.maximum(h_ref, 0.0)
            h_ref = h_ref.astype(jnp.bfloat16).astype(jnp.float32)

    assert out.shape == (N, out_size)
    assert jnp.allclose(out, h_ref, atol=2e-2, rtol=2e-2)

    print("KERNEL_OK")
</pallas_src>

<mosaic_0001>
module attributes {stable_mosaic.version = 11 : i64} {
  func.func @_xw_kernel(%arg0: i32, %arg1: memref<64x128xbf16, #tpu.memory_space<vmem>>, %arg2: memref<128x128xbf16, #tpu.memory_space<vmem>>, %arg3: memref<64x128xbf16, #tpu.memory_space<vmem>>) attributes {dimension_semantics = [#tpu.dimension_semantics<parallel>], iteration_bounds = array<i64: 2>, scalar_prefetch = 0 : i64, scratch_operands = 0 : i64, tpu.core_type = #tpu.core_type<tc>, window_params = [{transform_indices = @transform_0, window_bounds = array<i64: 64, 128>}, {pipeline_mode = #tpu.pipeline_mode<synchronous>, transform_indices = @transform_1, window_bounds = array<i64: 128, 128>}, {transform_indices = @transform_2, window_bounds = array<i64: 64, 128>}]} {
    %c0 = arith.constant 0 : index
    %c0_0 = arith.constant 0 : index
    %0 = vector.load %arg1[%c0, %c0_0] : memref<64x128xbf16, #tpu.memory_space<vmem>>, vector<64x128xbf16>
    %c0_1 = arith.constant 0 : index
    %c0_2 = arith.constant 0 : index
    %1 = vector.load %arg2[%c0_1, %c0_2] : memref<128x128xbf16, #tpu.memory_space<vmem>>, vector<128x128xbf16>
    %cst = arith.constant dense<0.000000e+00> : vector<64x128xf32>
    %2 = tpu.matmul %0, %1, %cst {dimension_numbers = #tpu.dot_dimension_numbers<[1], [0], [0], [1], [0, 0, 1, 1], [], []>} : vector<64x128xbf16>, vector<128x128xbf16>, vector<64x128xf32> -> vector<64x128xf32>
    %3 = arith.truncf %2 : vector<64x128xf32> to vector<64x128xbf16>
    %c0_3 = arith.constant 0 : index
    %c0_4 = arith.constant 0 : index
    %4 = vector.load %arg3[%c0_3, %c0_4] : memref<64x128xbf16, #tpu.memory_space<vmem>>, vector<64x128xbf16>
    tpu.vector_store %arg3[%c0_3, %c0_4], %3 {strides = array<i32>} : memref<64x128xbf16, #tpu.memory_space<vmem>>, vector<64x128xbf16>,
    return
  }
  func.func @transform_0(%arg0: i32) -> (i32, i32) {
    %c0_i32 = arith.constant 0 : i32
    %c0_i32_0 = arith.constant 0 : i32
    return %arg0, %c0_i32 : i32, i32
  }
  func.func @transform_1(%arg0: i32) -> (i32, i32) {
    %c0_i32 = arith.constant 0 : i32
    %c0_i32_0 = arith.constant 0 : i32
    %c0_i32_1 = arith.constant 0 : i32
    return %c0_i32, %c0_i32_0 : i32, i32
  }
  func.func @transform_2(%arg0: i32) -> (i32, i32) {
    %c0_i32 = arith.constant 0 : i32
    %c0_i32_0 = arith.constant 0 : i32
    return %arg0, %c0_i32 : i32, i32
  }
}

</mosaic_0001>

<bundles_post_ra>
// kernel: tpu_custom_call.1
= control target key start
LH: loop header
LB: loop body
LE: loop exit
PB: predicated region body
PF: predicated region fallthrough
CT: control target
= control target key end

     0   :  { %7 = vsyncpa [#allocation3], 0  ;;  %s1041_s0 = inlined_call_operand.hbm [shape: bf16[128,128], index: 0, kind: input, shape index: {}]   ;;  %s1042_s1 = inlined_call_operand.hbm [shape: bf16[128,128], index: 1, kind: input, shape index: {}]   ;;  %s1043_s2 = inlined_call_operand.hbm [shape: bf16[128,128], index: 2, kind: output, shape index: {}]  }
   0x1   :  { %9 = vsyncpa [#allocation3 + $0x1], 0 }
   0x2   :  { %10 = vsyncpa [#allocation6], 0 }
   0x3   :  { %11 = vsyncpa [#allocation4], 0 }
   0x4   :  { %13 = vsyncpa [#allocation4 + $0x1], 0  ;;  %s824_s9 = smov 0   ;;  %s826_s10 = smov 0  }
   0x5   :  { %s828_s11 = smov 0   ;;  %s830_s12 = smov 0  }
   0x6 LB: > { %s845_s13 = sadd.s32 4294967295, %s800_s12   ;;  %s478_s14 = sadd.s32 4294967294, %s800_s12   ;;  %s800_s12 = sphi %s830_s12, %s1063_s12   ;;  %s796_s11 = sphi %s828_s11, %s1062_s11   ;;  %s792_s10 = sphi %s826_s10, %s1061_s10   ;;  %s788_s9 = sphi %s824_s9, %s1060_s9  }
   0x7   : > { %p39_p0 = scmp.ne.s32.totalorder %s792_s10, %s788_s9  ;;  %p1044_p1 = scmp.eq.s32.totalorder %s845_s13, 0 }
   0x8   : > { %p90_p3 = scmp.eq.s32.totalorder %s478_s14, 1  ;;  %p479_p5 = scmp.ge.s32.totalorder %s800_s12, 1 }
   0x9   : > { %p854_p4 = por %p1044_p1, %p39_p0  ;;  %p97_p7 = scmp.lt.s32.totalorder %s800_s12, 3 }
   0xa   : > { %p859_p6 = por %p90_p3, %p39_p0  ;;  %s802_s18 = smov [#allocation5]  }
   0xb   : > { %s1047_s15 = scalar_select %p854_p4, 1, 0 }
   0xc   : > { %s1048_s16 = scalar_select %p859_p6, 1, 0 }
   0xd   : > { %p864_p8 = pnand %p479_p5, %p97_p7  ;;  %s109_s19 = sshll.u32 %s802_s18, 4  ;;  %s868_s19 = int_to_ptr.vmem [resolvable:$true] %s109_s19 }
   0xe   : > { %s880_s21 = sadd.s32 1, %s800_s12   ;;  %s26_s22 = sadd.s32 1, %s796_s11 }
   0xf   : > { %s1049_s17 = scalar_select %p864_p8, 1, 0 }
  0x10   : > { %p607_p9 = pneg %p864_p8  ;;  %s23_s23 = ssub.s32 %s800_s12, %s880_s21 }
  0x11   : > { %s672_s26 = scalar_lea.hbm %s1042_s1, 1024 }
  0x12   : > { %p875_p11 = pnand %p607_p9, %p1044_p1  ;;  %p673_p12 = scmp.ne.s32.totalorder %s1042_s1, %s672_s26 }
  0x13   : > { %p679_p5 = scmp.lt.u32.totalorder %s672_s26, %s1042_s1 }
  0x14   : > { %p674_p13 = pneg %p875_p11 }
  0x16   : > { %p675_p0 = pnand %p674_p13, %p673_p12 }
  0x18   : > { %p676_p3 = pneg %p675_p0 }
  0x1a   : > { %p681_p7 = pnand %p679_p5, %p676_p3 }
  0x1c   : > { %684 = shalt.err (!%p681_p7)
}
  0x1d   : > { %s685_s3 = scalar_lea.vmem %s868_s19, 1024  ;;  %p693_p2 = scmp.lt.s32.totalorder %s868_s19, %s868_s19 }
  0x1e   : > { %p686_p9 = scmp.ne.s32.totalorder %s868_s19, %s685_s3  ;;  %p694_p6 = scmp.lt.s32.totalorder %s685_s3, %s685_s3 }
  0x20   : > { %p688_p10 = pnand %p686_p9, %p674_p13  ;;  %p695_p4 = por %p694_p6, %p693_p2 }
  0x22   : > { %p689_p1 = pneg %p688_p10 }
  0x24   : > { %p696_p8 = pnand %p695_p4, %p689_p1 }
  0x26   : > { %699 = shalt.err (!%p696_p8)
}
  0x27   : > { %s803_s4 = smov 64   ;;  %s804_s5 = smov 4  }
  0x28   : > { %610 = dma.hbm_to_vmem [thread:$0]  (!%p875_p11), %s1042_s1, 1024, %s868_s19, [#allocation6], %s803_s4, %s803_s4, %s804_s5  }
  0x29   : > { %p24_p1 = scmp.eq.s32.totalorder %s23_s23, 0  ;;  %p33_p2 = scmp.ne.s32.totalorder %s796_s11, %s792_s10 }
  0x2a   : > { %p34_p4 = scmp.eq.s32.totalorder %s800_s12, 0  ;;  %p620_p6 = scmp.lt.s32.totalorder %s800_s12, 2 }
  0x2b   : > { %s914_s8 = scalar_select %p24_p1, %s796_s11, %s26_s22  }
  0x2c   : > { %p35_p8 = por %p34_p4, %p33_p2  ;;  %p1051_p10 = scmp.eq.s32.totalorder %s845_s13, 1 }
  0x2d   : > { %s123_s18 = sand.u32 1, %s796_s11   ;;  %s514_s20 = sshll.u32 %s800_s12, 9 }
  0x2e   : > { %p918_p12 = por %p1051_p10, %p33_p2  ;;  %s482_s24 = sshll.u32 %s123_s18, 5 }
  0x2f   : > { %s927_s27 = scalar_lea.hbm %s1041_s0, %s514_s20  ;;  %s127_s19 = scalar_lea.vmem [#allocation2], %s482_s24 }
  0x30   : > { %s134_s22 = sshll.u32 %s127_s19, 4  ;;  %p929_p11 = pnand %p620_p6, %p35_p8  ;;  %s933_s22 = int_to_ptr.vmem [resolvable:$true] %s134_s22 }
  0x31   : > { %s935_s28 = scalar_lea.sflag [#allocation3], %s123_s18  ;;  %s700_s29 = scalar_lea.hbm %s927_s27, 512 }
  0x32   : > { %p701_p13 = scmp.ne.s32.totalorder %s927_s27, %s700_s29  ;;  %p702_p0 = pneg %p929_p11 }
  0x33   : > { %s705_s6 = scalar_lea.hbm %s1041_s0, 1024  ;;  %p706_p7 = scmp.lt.u32.totalorder %s927_s27, %s1041_s0 }
  0x34   : > { %p703_p3 = pnand %p702_p0, %p701_p13  ;;  %p707_p9 = scmp.lt.u32.totalorder %s705_s6, %s700_s29 }
  0x35   : > { %p709_p2 = scmp.lt.u32.totalorder %s700_s29, %s927_s27 }
  0x36   : > { %p704_p5 = pneg %p703_p3  ;;  %p708_p1 = por %p707_p9, %p706_p7 }
  0x38   : > { %p710_p4 = por %p709_p2, %p708_p1 }
  0x3a   : > { %p711_p6 = pnand %p710_p4, %p704_p5 }
  0x3c   : > { %714 = shalt.err (!%p711_p6)
}
  0x3d   : > { %s715_s18 = scalar_lea.vmem %s933_s22, 512  ;;  %s805_s24 = smov [#allocation2]  }
  0x3e   : > { %p716_p8 = scmp.ne.s32.totalorder %s933_s22, %s715_s18  ;;  %s720_s25 = sshll.u32 %s805_s24, 4  ;;  %s721_s25 = int_to_ptr.vmem [resolvable:$false] %s720_s25 }
  0x3f   : > { %s722_s26 = scalar_lea.vmem %s721_s25, 1024  ;;  %p723_p3 = scmp.lt.s32.totalorder %s933_s22, %s721_s25 }
  0x40   : > { %p718_p10 = pnand %p716_p8, %p702_p0  ;;  %p724_p7 = scmp.lt.s32.totalorder %s722_s26, %s715_s18 }
  0x42   : > { %p719_p13 = pneg %p718_p10  ;;  %p725_p9 = por %p724_p7, %p723_p3 }
  0x44   : > { %p726_p1 = pnand %p725_p9, %p719_p13 }
  0x46   : > { %729 = shalt.err (!%p726_p1)
}
  0x47   : > { %614 = dma.hbm_to_vmem [thread:$0]  (!%p929_p11), %s927_s27, 512, %s933_s22, %s935_s28, %s803_s4, %s803_s4, %s804_s5  }
  0x48   : > { %p1054_p0 = scmp.ne.s32.totalorder %s1049_s17, 0 }
  0x49   : > { %s969_s19 = sand.u32 (!%p1054_p0), 1, %s792_s10   ;;  %p1055_p5 = scmp.ne.s32.totalorder (!%p1054_p0), %s1047_s15, 0 }
  0x4a   : > { %146 = sbr.rel (%p1054_p0) target bundleno = 350 (0x15e), region = 28  ;;  %s486_s29 = sshll.u32 (!%p1054_p0), %s969_s19, 5 }
  0x4b   : > { %s149_s30 = scalar_lea.sflag (!%p1054_p0), [#allocation3], %s969_s19  ;;  %s975_s23 = scalar_lea.vmem (!%p1054_p0), [#allocation2], %s486_s29 }
  0x51   : > { %775 = dma.done.wait (%p1055_p5), %s149_s30, 512  }
  0x52   : > { %777 = vsyncadd (%p1055_p5), %s149_s30, 4294966784  ;;  %p1056_p11 = scmp.eq.s32.totalorder %s845_s13, 0 }
  0x54   : > { %779 = dma.done.wait (%p1056_p11), [#allocation6], 1024   ;;  %p1057_p2 = pmov %p1056_p11 }
  0x55   : > { %v660_v0 = vld [vmem:[#allocation5] sm:$0xff]   ;;  %v661_v1 = vld [vmem:[#allocation5 + $0x8] sm:$0xff]   ;;  %v662_v2 = vld [vmem:[#allocation5 + $0x10] sm:$0xff]   ;;  %s176_s15 = scalar_lea.vmem [#allocation7], %s486_s29  ;;  %s523_s4 = sshll.u32 %s845_s13, 9 }
  0x56   : > { %781 = vsyncadd (%p1057_p2), [#allocation6], 4294966272  ;;  %559 = vmatprep.subr.bf16.mxu0 %v660_v0  ;;  %583 = vmatprep.subr.bf16.mxu1 %v660_v0  ;;  %v663_v3 = vld [vmem:[#allocation5 + $0x18] sm:$0xff]   ;;  %v668_v4 = vld [vmem:[%s975_s23] sm:$0xff]   ;;  %s395_s17 = sshll.u32 %s176_s15, 4  ;;  %s997_s22 = scalar_lea.hbm %s1043_s2, %s523_s4  ;;  %s992_s17 = int_to_ptr.vmem [resolvable:$true] %s395_s17 }
  0x57   : > { %560 = vmatpush3.bf16.msra.mxu0 %v660_v0  ;;  %591 = vmatpush3.bf16.msra.mxu1 %v660_v0  ;;  %v669_v5 = vld [vmem:[%s975_s23 + $0x10] sm:$0xff]   ;;  %v664_v6 = vld [vmem:[#allocation5 + $0x20] sm:$0xff]   ;;  %v665_v7 = vld [vmem:[#allocation5 + $0x28] sm:$0xff]   ;;  %s382_s13 = scalar_lea.sflag [#allocation4], %s969_s19  ;;  %s730_s28 = scalar_lea.vmem %s992_s17, 512 }
  0x58   : > { %561 = vmatprep.subr.bf16.mxu0 %v661_v1  ;;  %584 = vmatprep.subr.bf16.mxu1 %v661_v1  ;;  %v666_v8 = vld [vmem:[#allocation5 + $0x30] sm:$0xff]   ;;  %v667_v9 = vld [vmem:[#allocation5 + $0x38] sm:$0xff]   ;;  %v670_v10 = vld [vmem:[%s975_s23 + $0x8] sm:$0xff]   ;;  %p731_p4 = scmp.ne.s32.totalorder %s992_s17, %s730_s28  ;;  %s806_s3 = smov [#allocation7]  }
  0x59   : > { %575 = vmatprep.mubr.bf16.mxu0 %v668_v4  ;;  %579 = vmatprep.mubr.bf16.mxu1 %v669_v5  ;;  %v671_v11 = vld [vmem:[%s975_s23 + $0x18] sm:$0xff]   ;;  %s734_s6 = sshll.u32 %s806_s3, 4  ;;  %s735_s6 = int_to_ptr.vmem [resolvable:$false] %s734_s6 }
  0x5a   : > { %p732_p6 = pnand %p731_p4, %p918_p12  ;;  %s736_s7 = scalar_lea.vmem %s735_s6, 1024 }
  0x5b   : > { %562 = vmatpush3.bf16.msra.mxu0 %v661_v1  ;;  %592 = vmatpush3.bf16.msra.mxu1 %v661_v1  ;;  %p737_p10 = scmp.lt.s32.totalorder %s992_s17, %s735_s6  ;;  %p738_p13 = scmp.lt.s32.totalorder %s736_s7, %s730_s28 }
  0x5c   : > { %563 = vmatprep.subr.bf16.mxu0 %v662_v2  ;;  %585 = vmatprep.subr.bf16.mxu1 %v662_v2  ;;  %p733_p8 = pneg %p732_p6 }
  0x5d   : > { %p739_p3 = por %p738_p13, %p737_p10 }
  0x5f   : > { %564 = vmatpush3.bf16.msra.mxu0 %v662_v2  ;;  %593 = vmatpush3.bf16.msra.mxu1 %v662_v2  ;;  %p740_p7 = pnand %p739_p3, %p733_p8 }
  0x60   : > { %565 = vmatprep.subr.bf16.mxu0 %v663_v3  ;;  %586 = vmatprep.subr.bf16.mxu1 %v663_v3 }
  0x63   : > { %566 = vmatpush3.bf16.msra.mxu0 %v663_v3  ;;  %594 = vmatpush3.bf16.msra.mxu1 %v663_v3 }
  0x64   : > { %567 = vmatprep.subr.bf16.mxu0 %v664_v6  ;;  %587 = vmatprep.subr.bf16.mxu1 %v664_v6 }
  0x67   : > { %568 = vmatpush3.bf16.msra.mxu0 %v664_v6  ;;  %595 = vmatpush3.bf16.msra.mxu1 %v664_v6 }
  0x68   : > { %569 = vmatprep.subr.bf16.mxu0 %v665_v7  ;;  %588 = vmatprep.subr.bf16.mxu1 %v665_v7 }
  0x6b   : > { %570 = vmatpush3.bf16.msra.mxu0 %v665_v7  ;;  %596 = vmatpush3.bf16.msra.mxu1 %v665_v7 }
  0x6c   : > { %571 = vmatprep.subr.bf16.mxu0 %v666_v8  ;;  %589 = vmatprep.subr.bf16.mxu1 %v666_v8 }
  0x6f   : > { %572 = vmatpush3.bf16.msra.mxu0 %v666_v8  ;;  %597 = vmatpush3.bf16.msra.mxu1 %v666_v8 }
  0x70   : > { %573 = vmatprep.subr.bf16.mxu0 %v667_v9  ;;  %590 = vmatprep.subr.bf16.mxu1 %v667_v9 }
  0x73   : > { %574 = vmatpush3.bf16.msra.mxu0 %v667_v9  ;;  %598 = vmatpush3.bf16.msra.mxu1 %v667_v9 }
  0x76   : > { %576 = vmatmul.mubr.bf16.vlgmr.msra.gmra.mrb[0].mxu0 %v670_v10  ;;  %580 = vmatmul.mubr.bf16.vlgmr.msra.gmra.mrb[0].mxu1 %v671_v11 }
 0x149   : > { %v577_v12 = vpop.f32.mrb[0].mxu0  ;;  %v581_v13 = vpop.f32.mrb[0].mxu1 }
 0x14a   : > { %v310_v14 = vpop.f32.mrb[1].mxu0  ;;  %v326_v15 = vpop.f32.mrb[1].mxu1 }
 0x14b   : > { %v578_v16 = vpop.f32.mrb[2].mxu0  ;;  %v582_v17 = vpop.f32.mrb[2].mxu1 }
 0x14c   : > { %v532_v18 = vpack.c.bf16 %v578_v16, %v577_v12  ;;  %v542_v19 = vpack.c.bf16 %v582_v17, %v581_v13  ;;  %v313_v20 = vpop.f32.mrb[3].mxu0  ;;  %v329_v21 = vpop.f32.mrb[3].mxu1 }
 0x14d   : > { %v527_v22 = vpack.c.bf16 %v313_v20, %v310_v14  ;;  %v537_v23 = vpack.c.bf16 %v329_v21, %v326_v15 }
 0x14e   : > { %544 = vst [vmem:[%s176_s15 + $0x8] sm:$0xff] %v532_v18   ;;  %546 = vst [vmem:[%s176_s15 + $0x18] sm:$0xff] %v542_v19  }
 0x14f   : > { %528 = vst [vmem:[%s176_s15] sm:$0xff] %v527_v22   ;;  %545 = vst [vmem:[%s176_s15 + $0x10] sm:$0xff] %v537_v23  }
 0x150   : > { %743 = shalt.err (!%p740_p7)
}
 0x151   : > { %s744_s20 = scalar_lea.hbm %s997_s22, 512  ;;  %s748_s25 = scalar_lea.hbm %s1043_s2, 1024 }
 0x152   : > { %p745_p9 = scmp.ne.s32.totalorder %s997_s22, %s744_s20  ;;  %p749_p5 = scmp.lt.u32.totalorder %s997_s22, %s1043_s2 }
 0x153   : > { %p750_p11 = scmp.lt.u32.totalorder %s748_s25, %s744_s20  ;;  %p752_p4 = scmp.lt.u32.totalorder %s744_s20, %s997_s22 }
 0x154   : > { %p746_p1 = pnand %p745_p9, %p918_p12 }
 0x155   : > { %p751_p2 = por %p750_p11, %p749_p5 }
 0x156   : > { %p747_p0 = pneg %p746_p1 }
 0x157   : > { %p753_p6 = por %p752_p4, %p751_p2 }
 0x159   : > { %p754_p8 = pnand %p753_p6, %p747_p0 }
 0x15b   : > { %757 = shalt.err (!%p754_p8)
}
 0x15c   : > { %s807_s30 = smov 64   ;;  %s808_s23 = smov 4  }
 0x15d   : > { %605 = dma.vmem_to_hbm [thread:$0]  (%p918_p12), %s992_s17, 512, %s997_s22, %s382_s13, %s807_s30, %s807_s30, %s808_s23  }
 0x15e PF: > { %s410_s15 = sand.u32 1, %s788_s9   ;;  %p1058_p10 = scmp.ne.s32.totalorder %s1048_s16, 0 }
 0x15f   : > { %p1059_p13 = scmp.ge.s32.totalorder %s800_s12, 2  ;;  %s411_s4 = scalar_lea.sflag [#allocation4], %s410_s15 }
 0x161   : > { %p616_p3 = pnand %p1059_p13, %p1058_p10 }
 0x163   : > { %783 = dma.done.wait (!%p616_p3), %s411_s4, 512  }
 0x164   : > { %785 = vsyncadd (!%p616_p3), %s411_s4, 4294966784  ;;  %p16_p7 = scmp.ge.s32.totalorder %s880_s21, 4   ;;  %s1060_s9 = smov %s792_s10 }
 0x165   : > { %s1061_s10 = smov %s796_s11  ;;  %s1062_s11 = smov %s914_s8 }
 0x166   : > { %s1063_s12 = smov %s880_s21  ;;  %18 = sbr.rel (!%p16_p7) target bundleno = 6 (0x6), region = 77 }
 0x16d   :  { %416 = vsyncpa [#allocation3], 1 }
 0x16e   :  { %418 = vsyncpa [#allocation3 + $0x1], 1 }
 0x16f   :  { %419 = vsyncpa [#allocation6], 1 }
 0x170   :  { %420 = vsyncpa [#allocation4], 1 }
 0x171   :  { %422 = vsyncpa [#allocation4 + $0x1], 1 }

</bundles_post_ra>
